<compile_context>
chip_gen: v7x
topology: tpu7x:2x2x1
jax: 0.10.0
libtpu: 0.0.40
codegen_flags: <defaults>
</compile_context>

<pallas_src>
import jax
import jax.numpy as jnp
from jax.experimental import pallas as pl
from jax.experimental.pallas import tpu as pltpu


# ------------------------- elementwise residual add -------------------------

def _residual_add_kernel(fx_ref, res_ref, o_ref):
    o_ref[...] = fx_ref[...] + res_ref[...]


def fused_residual_add(fx, res, *, vmem_bytes_per_buffer=4 << 20):
    """out = fx + res (elementwise), tiled over rows, last dim lane-dense.

    The row tile is derived from a per-buffer VMEM byte budget (3 arrays,
    each double-buffered by the pipeline), not a fixed row count, so large
    last dims cannot blow past the scoped VMEM limit on any generation.
    """
    assert fx.shape == res.shape
    res = res.astype(fx.dtype)
    shape = fx.shape
    last = shape[-1]
    rows = fx.size // last
    a = fx.reshape(rows, last)
    b = res.reshape(rows, last)

    itemsize = jnp.dtype(fx.dtype).itemsize
    tm_budget = max(8, vmem_bytes_per_buffer // (last * itemsize))
    if rows <= tm_budget:
        tm = rows                       # whole-dim block is always legal
    else:
        tm = (tm_budget // 8) * 8       # multiple of 8 (sublane granularity)

    grid = (pl.cdiv(rows, tm),)
    out = pl.pallas_call(
        _residual_add_kernel,
        out_shape=jax.ShapeDtypeStruct((rows, last), fx.dtype),
        grid=grid,
        in_specs=[pl.BlockSpec((tm, last), lambda i: (i, 0)),
                  pl.BlockSpec((tm, last), lambda i: (i, 0))],
        out_specs=pl.BlockSpec((tm, last), lambda i: (i, 0)),
        compiler_params=pltpu.CompilerParams(
            dimension_semantics=("parallel",)),
        cost_estimate=pl.CostEstimate(
            flops=rows * last,
            transcendentals=0,
            bytes_accessed=3 * rows * last * itemsize),
    )(a, b)
    return out.reshape(shape)


def residual_add(fn, x, **kwargs):
    """ResidualAdd.forward:  res = x; x = fn(x, **kwargs); x += res; return x."""
    return fused_residual_add(fn(x, **kwargs), x)


# -------- fully fused ViT sublayer: Linear -> GELU -> Linear -> +residual ----

def _ffn_residual_kernel(x_ref, w1_ref, b1_ref, w2_ref, b2_ref, o_ref, acc_ref):
    h = pl.program_id(1)

    # First matmul (bf16 operands, f32 accumulation) + bias + GELU for this
    # hidden tile; the hidden activation never touches HBM.
    xb = x_ref[...].astype(jnp.bfloat16)
    pre = jnp.dot(xb, w1_ref[...], preferred_element_type=jnp.float32)
    act = jax.nn.gelu(pre + b1_ref[...], approximate=True)

    # Second matmul: partial contribution of this hidden tile to the output.
    contrib = jnp.dot(act.astype(jnp.bfloat16), w2_ref[...],
                      preferred_element_type=jnp.float32)

    # First step overwrites the accumulator (saves a zero-init store pass).
    @pl.when(h == 0)
    def _():
        acc_ref[...] = contrib

    @pl.when(h > 0)
    def _():
        acc_ref[...] += contrib

    # Epilogue: bias2 + residual (kept in f32), cast to output dtype.
    @pl.when(h == pl.num_programs(1) - 1)
    def _():
        out = acc_ref[...] + b2_ref[...] + x_ref[...].astype(jnp.float32)
        o_ref[...] = out.astype(o_ref.dtype)


def ffn_residual(x, w1, b1, w2, b2, *, tm=256, th=512):
    """out = gelu(x @ w1 + b1) @ w2 + b2 + x  in a single Pallas kernel."""
    orig_shape = x.shape
    E = orig_shape[-1]
    M = x.size // E
    H = w1.shape[1]
    assert w1.shape == (E, H) and w2.shape == (H, E)
    assert b1.shape == (H,) and b2.shape == (E,)
    assert E % 128 == 0 and H % 128 == 0, "ViT dims expected multiples of 128"

    x2 = x.reshape(M, E)
    # bf16 weights: full-rate MXU on every generation, half the HBM bytes.
    w1b = w1.astype(jnp.bfloat16)
    w2b = w2.astype(jnp.bfloat16)
    b1f = b1.reshape(1, H).astype(jnp.float32)
    b2f = b2.reshape(1, E).astype(jnp.float32)

    # Hidden tile must divide H exactly (it is the contraction axis of the
    # second matmul, so a ragged tile would accumulate garbage).  H is a
    # multiple of 128, so this terminates at a 128-multiple divisor.
    th = min(th, H)
    while H % th:
        th -= 128

    # Row tile: multiple of 8 (or the full M); split so >= 2 parallel blocks
    # exist when M allows, keeping both v7x TensorCores busy.
    tm = min(tm, M)
    if M > 8 and pl.cdiv(M, tm) < 2:
        tm = ((M + 15) // 16) * 8        # ~M/2, rounded up to a multiple of 8

    grid = (pl.cdiv(M, tm), H // th)

    # VMEM footprint (double-buffered inputs/outputs + f32 accumulator).
    vmem_bytes = (2 * tm * E * 4            # x tile (f32)
                  + 2 * E * th * 2          # w1 tile (bf16)
                  + 2 * th * E * 2          # w2 tile (bf16)
                  + 2 * th * 4 + 2 * E * 4  # biases (f32)
                  + 2 * tm * E * 4          # output tile (f32)
                  + tm * E * 4)             # accumulator scratch
    vmem_limit = min(64 << 20, max(32 << 20, 2 * vmem_bytes))

    cost = pl.CostEstimate(
        flops=4 * M * E * H,                       # two matmuls
        transcendentals=M * H,                     # GELU (tanh) per hidden elt
        bytes_accessed=(4 * M * E                  # x
                        + 2 * E * H + 2 * H * E    # bf16 weights
                        + 4 * H + 4 * E            # biases
                        + 4 * M * E))              # output

    out = pl.pallas_call(
        _ffn_residual_kernel,
        out_shape=jax.ShapeDtypeStruct((M, E), x.dtype),
        grid_spec=pltpu.PrefetchScalarGridSpec(
            num_scalar_prefetch=0,
            grid=grid,
            in_specs=[
                pl.BlockSpec((tm, E), lambda i, h: (i, 0)),   # x (resident over h)
                pl.BlockSpec((E, th), lambda i, h: (0, h)),   # w1 hidden tile
                pl.BlockSpec((1, th), lambda i, h: (0, h)),   # b1 hidden tile
                pl.BlockSpec((th, E), lambda i, h: (h, 0)),   # w2 hidden tile
                pl.BlockSpec((1, E), lambda i, h: (0, 0)),    # b2
            ],
            out_specs=pl.BlockSpec((tm, E), lambda i, h: (i, 0)),
            scratch_shapes=[pltpu.VMEM((tm, E), jnp.float32)]),
        compiler_params=pltpu.CompilerParams(
            dimension_semantics=("parallel", "arbitrary"),
            vmem_limit_bytes=vmem_limit),
        cost_estimate=cost,
    )(x2, w1b, b1f, w2b, b2f)
    return out.reshape(orig_shape)


# --------------------------------- main --------------------------------------

if __name__ == "__main__":
    key = jax.random.PRNGKey(0)
    k0, k1, k2 = jax.random.split(key, 3)

    # ViT-style token stream: M = B*SEQ = 128 rows, EMB = 256, hidden = 1024.
    B, SEQ, EMB = 2, 64, 256
    HID = 4 * EMB

    x = jax.random.normal(k0, (B, SEQ, EMB), jnp.float32)
    w1 = 0.02 * jax.random.normal(k1, (EMB, HID), jnp.float32)
    b1 = jnp.zeros((HID,), jnp.float32)
    w2 = 0.02 * jax.random.normal(k2, (HID, EMB), jnp.float32)
    b2 = jnp.zeros((EMB,), jnp.float32)

    def fn(t):
        # An "opaque" user sublayer (plain JAX) to exercise the generic path.
        t2 = t.reshape(-1, EMB)
        h = jax.nn.gelu(
            jnp.dot(t2, w1, precision=jax.lax.Precision.HIGHEST) + b1,
            approximate=True)
        o = jnp.dot(h, w2, precision=jax.lax.Precision.HIGHEST) + b2
        return o.reshape(t.shape)

    @jax.jit
    def forward_generic(x):
        # Exact module semantics for arbitrary fn; "+ res" is the Pallas kernel.
        return residual_add(fn, x)

    @jax.jit
    def forward_fused(x):
        # Linear -> GELU -> Linear -> +residual in one Pallas kernel
        # (bf16 MXU, f32 accumulator, no HBM round trip for the hidden).
        return ffn_residual(x, w1, b1, w2, b2)

    out_a = jax.block_until_ready(forward_generic(x))
    out_b = jax.block_until_ready(forward_fused(x))

    # Pure-JAX high-precision reference.
    x2 = x.reshape(-1, EMB)
    h_ref = jax.nn.gelu(
        jnp.dot(x2, w1, precision=jax.lax.Precision.HIGHEST) + b1,
        approximate=True)
    ref = (jnp.dot(h_ref, w2, precision=jax.lax.Precision.HIGHEST)
           + b2 + x2).reshape(x.shape)

    assert out_a.shape == x.shape and out_a.dtype == x.dtype
    assert out_b.shape == x.shape and out_b.dtype == x.dtype
    # Generic path: f32 everywhere -> tight tolerance.
    assert jnp.allclose(out_a, ref, atol=1e-4, rtol=1e-4), "generic mismatch"
    # Fused path: bf16 MXU operands with f32 accumulation -> looser tolerance.
    assert jnp.allclose(out_b, ref, atol=2e-2, rtol=2e-2), "fused mismatch"
    print("KERNEL_OK")
</pallas_src>

<mosaic_0001>
module attributes {stable_mosaic.version = 11 : i64} {
  func.func @_residual_add_kernel(%arg0: i32, %arg1: memref<128x256xf32, #tpu.memory_space<vmem>>, %arg2: memref<128x256xf32, #tpu.memory_space<vmem>>, %arg3: memref<128x256xf32, #tpu.memory_space<vmem>>) attributes {dimension_semantics = [#tpu.dimension_semantics<parallel>], iteration_bounds = array<i64: 1>, scalar_prefetch = 0 : i64, scratch_operands = 0 : i64, tpu.core_type = #tpu.core_type<tc>, window_params = [{transform_indices = @transform_0, window_bounds = array<i64: 128, 256>}, {transform_indices = @transform_1, window_bounds = array<i64: 128, 256>}, {transform_indices = @transform_2, window_bounds = array<i64: 128, 256>}]} {
    %c0 = arith.constant 0 : index
    %c0_0 = arith.constant 0 : index
    %0 = vector.load %arg1[%c0, %c0_0] : memref<128x256xf32, #tpu.memory_space<vmem>>, vector<128x256xf32>
    %c0_1 = arith.constant 0 : index
    %c0_2 = arith.constant 0 : index
    %1 = vector.load %arg2[%c0_1, %c0_2] : memref<128x256xf32, #tpu.memory_space<vmem>>, vector<128x256xf32>
    %2 = arith.addf %0, %1 : vector<128x256xf32>
    %c0_3 = arith.constant 0 : index
    %c0_4 = arith.constant 0 : index
    %3 = vector.load %arg3[%c0_3, %c0_4] : memref<128x256xf32, #tpu.memory_space<vmem>>, vector<128x256xf32>
    tpu.vector_store %arg3[%c0_3, %c0_4], %2 {strides = array<i32>} : memref<128x256xf32, #tpu.memory_space<vmem>>, vector<128x256xf32>,
    return
  }
  func.func @transform_0(%arg0: i32) -> (i32, i32) {
    %c0_i32 = arith.constant 0 : i32
    %c0_i32_0 = arith.constant 0 : i32
    return %arg0, %c0_i32 : i32, i32
  }
  func.func @transform_1(%arg0: i32) -> (i32, i32) {
    %c0_i32 = arith.constant 0 : i32
    %c0_i32_0 = arith.constant 0 : i32
    return %arg0, %c0_i32 : i32, i32
  }
  func.func @transform_2(%arg0: i32) -> (i32, i32) {
    %c0_i32 = arith.constant 0 : i32
    %c0_i32_0 = arith.constant 0 : i32
    return %arg0, %c0_i32 : i32, i32
  }
}

</mosaic_0001>

<bundles_post_ra>
// kernel: forward_generic.1
= control target key start
LH: loop header
LB: loop body
LE: loop exit
PB: predicated region body
PF: predicated region fallthrough
CT: control target
= control target key end

     0   :  { %s183_s17 = smov [#allocation2]   ;;  %s405_s0 = inlined_call_operand.vmem [shape: f32[128,256], index: 0, kind: input, shape index: {}]   ;;  %s406_s1 = inlined_call_operand.vmem [shape: f32[128,256], index: 1, kind: input, shape index: {}]   ;;  %s407_s2 = inlined_call_operand.hbm [shape: f32[128,256], index: 2, kind: output, shape index: {}]  }
   0x1   :  { %v12_v0 = vld [vmem:[%s405_s0] sm:$0xff]  ;;  %v13_v2 = vld [vmem:[%s405_s0 + $0x8] sm:$0xff]  ;;  %v14_v5 = vld [vmem:[%s405_s0 + $0x10] sm:$0xff]  ;;  %s145_s18 = sshll.u32 %s183_s17, 4  ;;  %s146_s18 = int_to_ptr.vmem [resolvable:$true] %s145_s18 }
   0x2   :  { %v44_v1 = vld [vmem:[%s406_s1] sm:$0xff]  ;;  %v45_v4 = vld [vmem:[%s406_s1 + $0x8] sm:$0xff]  ;;  %v46_v6 = vld [vmem:[%s406_s1 + $0x10] sm:$0xff] }
   0x3   :  { %v76_v3 = vadd.f32 %v44_v1, %v12_v0  ;;  %v77_v7 = vadd.f32 %v45_v4, %v13_v2  ;;  %v78_v8 = vadd.f32 %v46_v6, %v14_v5  ;;  %v15_v9 = vld [vmem:[%s405_s0 + $0x18] sm:$0xff]  ;;  %v16_v11 = vld [vmem:[%s405_s0 + $0x20] sm:$0xff]  ;;  %v17_v14 = vld [vmem:[%s405_s0 + $0x28] sm:$0xff] }
   0x4   :  { %v47_v10 = vld [vmem:[%s406_s1 + $0x18] sm:$0xff]  ;;  %v48_v13 = vld [vmem:[%s406_s1 + $0x20] sm:$0xff]  ;;  %v49_v15 = vld [vmem:[%s406_s1 + $0x28] sm:$0xff] }
   0x5   :  { %108 = vst [vmem:[#allocation2] sm:$0xff] %v76_v3  ;;  %v79_v12 = vadd.f32 %v47_v10, %v15_v9  ;;  %109 = vst [vmem:[#allocation2 + $0x8] sm:$0xff] %v77_v7  ;;  %v80_v16 = vadd.f32 %v48_v13, %v16_v11  ;;  %v81_v17 = vadd.f32 %v49_v15, %v17_v14  ;;  %v18_v18 = vld [vmem:[%s405_s0 + $0x30] sm:$0xff]  ;;  %v19_v20 = vld [vmem:[%s405_s0 + $0x38] sm:$0xff] }
   0x6   :  { %110 = vst [vmem:[#allocation2 + $0x10] sm:$0xff] %v78_v8  ;;  %v50_v19 = vld [vmem:[%s406_s1 + $0x30] sm:$0xff]  ;;  %v51_v22 = vld [vmem:[%s406_s1 + $0x38] sm:$0xff]  ;;  %v20_v23 = vld [vmem:[%s405_s0 + $0x40] sm:$0xff] }
   0x7   :  { %111 = vst [vmem:[#allocation2 + $0x18] sm:$0xff] %v79_v12  ;;  %v82_v21 = vadd.f32 %v50_v19, %v18_v18  ;;  %v52_v24 = vld [vmem:[%s406_s1 + $0x40] sm:$0xff]  ;;  %112 = vst [vmem:[#allocation2 + $0x20] sm:$0xff] %v80_v16  ;;  %v83_v25 = vadd.f32 %v51_v22, %v19_v20  ;;  %v21_v27 = vld [vmem:[%s405_s0 + $0x48] sm:$0xff] }
   0x8   :  { %113 = vst [vmem:[#allocation2 + $0x28] sm:$0xff] %v81_v17  ;;  %v84_v26 = vadd.f32 %v52_v24, %v20_v23  ;;  %v53_v28 = vld [vmem:[%s406_s1 + $0x48] sm:$0xff]  ;;  %v22_v29 = vld [vmem:[%s405_s0 + $0x50] sm:$0xff]  ;;  %v23_v32 = vld [vmem:[%s405_s0 + $0x58] sm:$0xff] }
   0x9   :  { %114 = vst [vmem:[#allocation2 + $0x30] sm:$0xff] %v82_v21  ;;  %v85_v30 = vadd.f32 %v53_v28, %v21_v27  ;;  %v54_v31 = vld [vmem:[%s406_s1 + $0x50] sm:$0xff]  ;;  %v55_v33 = vld [vmem:[%s406_s1 + $0x58] sm:$0xff]  ;;  %115 = vst [vmem:[#allocation2 + $0x38] sm:$0xff] %v83_v25 }
   0xa   :  { %116 = vst [vmem:[#allocation2 + $0x40] sm:$0xff] %v84_v26  ;;  %v86_v34 = vadd.f32 %v54_v31, %v22_v29  ;;  %v87_v35 = vadd.f32 %v55_v33, %v23_v32  ;;  %v24_v36 = vld [vmem:[%s405_s0 + $0x60] sm:$0xff]  ;;  %v25_v38 = vld [vmem:[%s405_s0 + $0x68] sm:$0xff]  ;;  %v26_v41 = vld [vmem:[%s405_s0 + $0x70] sm:$0xff] }
   0xb   :  { %v56_v37 = vld [vmem:[%s406_s1 + $0x60] sm:$0xff]  ;;  %117 = vst [vmem:[#allocation2 + $0x48] sm:$0xff] %v85_v30  ;;  %v57_v40 = vld [vmem:[%s406_s1 + $0x68] sm:$0xff]  ;;  %v58_v42 = vld [vmem:[%s406_s1 + $0x70] sm:$0xff] }
   0xc   :  { %v88_v39 = vadd.f32 %v56_v37, %v24_v36  ;;  %118 = vst [vmem:[#allocation2 + $0x50] sm:$0xff] %v86_v34  ;;  %119 = vst [vmem:[#allocation2 + $0x58] sm:$0xff] %v87_v35  ;;  %v89_v43 = vadd.f32 %v57_v40, %v25_v38  ;;  %v90_v44 = vadd.f32 %v58_v42, %v26_v41  ;;  %v27_v45 = vld [vmem:[%s405_s0 + $0x78] sm:$0xff]  ;;  %v28_v47 = vld [vmem:[%s405_s0 + $0x80] sm:$0xff] }
   0xd   :  { %v59_v46 = vld [vmem:[%s406_s1 + $0x78] sm:$0xff]  ;;  %v60_v49 = vld [vmem:[%s406_s1 + $0x80] sm:$0xff]  ;;  %v29_v50 = vld [vmem:[%s405_s0 + $0x88] sm:$0xff] }
   0xe   :  { %120 = vst [vmem:[#allocation2 + $0x60] sm:$0xff] %v88_v39  ;;  %v91_v48 = vadd.f32 %v59_v46, %v27_v45  ;;  %v61_v51 = vld [vmem:[%s406_s1 + $0x88] sm:$0xff]  ;;  %121 = vst [vmem:[#allocation2 + $0x68] sm:$0xff] %v89_v43  ;;  %v92_v52 = vadd.f32 %v60_v49, %v28_v47  ;;  %v30_v54 = vld [vmem:[%s405_s0 + $0x90] sm:$0xff] }
   0xf   :  { %122 = vst [vmem:[#allocation2 + $0x70] sm:$0xff] %v90_v44  ;;  %v93_v53 = vadd.f32 %v61_v51, %v29_v50  ;;  %v62_v55 = vld [vmem:[%s406_s1 + $0x90] sm:$0xff]  ;;  %v31_v56 = vld [vmem:[%s405_s0 + $0x98] sm:$0xff]  ;;  %v32_v59 = vld [vmem:[%s405_s0 + $0xa0] sm:$0xff] }
  0x10   :  { %123 = vst [vmem:[#allocation2 + $0x78] sm:$0xff] %v91_v48  ;;  %v94_v57 = vadd.f32 %v62_v55, %v30_v54  ;;  %v63_v58 = vld [vmem:[%s406_s1 + $0x98] sm:$0xff]  ;;  %v64_v60 = vld [vmem:[%s406_s1 + $0xa0] sm:$0xff]  ;;  %124 = vst [vmem:[#allocation2 + $0x80] sm:$0xff] %v92_v52 }
  0x11   :  { %125 = vst [vmem:[#allocation2 + $0x88] sm:$0xff] %v93_v53  ;;  %v95_v61 = vadd.f32 %v63_v58, %v31_v56  ;;  %v96_v62 = vadd.f32 %v64_v60, %v32_v59  ;;  %v33_v63 = vld [vmem:[%s405_s0 + $0xa8] sm:$0xff]  ;;  %v34_v1 = vld [vmem:[%s405_s0 + $0xb0] sm:$0xff]  ;;  %v35_v4 = vld [vmem:[%s405_s0 + $0xb8] sm:$0xff] }
  0x12   :  { %v65_v0 = vld [vmem:[%s406_s1 + $0xa8] sm:$0xff]  ;;  %126 = vst [vmem:[#allocation2 + $0x90] sm:$0xff] %v94_v57  ;;  %v66_v3 = vld [vmem:[%s406_s1 + $0xb0] sm:$0xff]  ;;  %v67_v5 = vld [vmem:[%s406_s1 + $0xb8] sm:$0xff] }
  0x13   :  { %v97_v2 = vadd.f32 %v65_v0, %v33_v63  ;;  %127 = vst [vmem:[#allocation2 + $0x98] sm:$0xff] %v95_v61  ;;  %128 = vst [vmem:[#allocation2 + $0xa0] sm:$0xff] %v96_v62  ;;  %v98_v6 = vadd.f32 %v66_v3, %v34_v1  ;;  %v99_v7 = vadd.f32 %v67_v5, %v35_v4  ;;  %v36_v8 = vld [vmem:[%s405_s0 + $0xc0] sm:$0xff]  ;;  %v37_v10 = vld [vmem:[%s405_s0 + $0xc8] sm:$0xff] }
  0x14   :  { %v68_v9 = vld [vmem:[%s406_s1 + $0xc0] sm:$0xff]  ;;  %v69_v12 = vld [vmem:[%s406_s1 + $0xc8] sm:$0xff]  ;;  %v38_v13 = vld [vmem:[%s405_s0 + $0xd0] sm:$0xff] }
  0x15   :  { %129 = vst [vmem:[#allocation2 + $0xa8] sm:$0xff] %v97_v2  ;;  %v100_v11 = vadd.f32 %v68_v9, %v36_v8  ;;  %v70_v14 = vld [vmem:[%s406_s1 + $0xd0] sm:$0xff]  ;;  %130 = vst [vmem:[#allocation2 + $0xb0] sm:$0xff] %v98_v6  ;;  %v101_v15 = vadd.f32 %v69_v12, %v37_v10  ;;  %v39_v17 = vld [vmem:[%s405_s0 + $0xd8] sm:$0xff] }
  0x16   :  { %131 = vst [vmem:[#allocation2 + $0xb8] sm:$0xff] %v99_v7  ;;  %v102_v16 = vadd.f32 %v70_v14, %v38_v13  ;;  %v71_v18 = vld [vmem:[%s406_s1 + $0xd8] sm:$0xff]  ;;  %v40_v19 = vld [vmem:[%s405_s0 + $0xe0] sm:$0xff]  ;;  %v41_v22 = vld [vmem:[%s405_s0 + $0xe8] sm:$0xff] }
  0x17   :  { %132 = vst [vmem:[#allocation2 + $0xc0] sm:$0xff] %v100_v11  ;;  %v103_v20 = vadd.f32 %v71_v18, %v39_v17  ;;  %v72_v21 = vld [vmem:[%s406_s1 + $0xe0] sm:$0xff]  ;;  %v73_v23 = vld [vmem:[%s406_s1 + $0xe8] sm:$0xff]  ;;  %133 = vst [vmem:[#allocation2 + $0xc8] sm:$0xff] %v101_v15 }
  0x18   :  { %134 = vst [vmem:[#allocation2 + $0xd0] sm:$0xff] %v102_v16  ;;  %v104_v24 = vadd.f32 %v72_v21, %v40_v19  ;;  %v105_v25 = vadd.f32 %v73_v23, %v41_v22  ;;  %v42_v26 = vld [vmem:[%s405_s0 + $0xf0] sm:$0xff]  ;;  %v43_v28 = vld [vmem:[%s405_s0 + $0xf8] sm:$0xff] }
  0x19   :  { %v74_v27 = vld [vmem:[%s406_s1 + $0xf0] sm:$0xff]  ;;  %135 = vst [vmem:[#allocation2 + $0xd8] sm:$0xff] %v103_v20  ;;  %v75_v30 = vld [vmem:[%s406_s1 + $0xf8] sm:$0xff] }
  0x1a   :  { %v106_v29 = vadd.f32 %v74_v27, %v42_v26 }
  0x1b   :  { %7 = vsyncpa [#allocation3], 0  ;;  %136 = vst [vmem:[#allocation2 + $0xe0] sm:$0xff] %v104_v24  ;;  %v107_v31 = vadd.f32 %v75_v30, %v43_v28  ;;  %s159_s27 = scalar_lea.vmem %s146_s18, 4096  ;;  %p164_p1 = scmp.lt.s32.totalorder %s146_s18, %s146_s18 }
  0x1c   :  { %137 = vst [vmem:[#allocation2 + $0xe8] sm:$0xff] %v105_v25  ;;  %138 = vst [vmem:[#allocation2 + $0xf0] sm:$0xff] %v106_v29  ;;  %p160_p0 = scmp.ne.s32.totalorder %s146_s18, %s159_s27  ;;  %p165_p2 = scmp.lt.s32.totalorder %s159_s27, %s159_s27 }
  0x1d   :  { %139 = vst [vmem:[#allocation2 + $0xf8] sm:$0xff] %v107_v31 }
  0x1e   :  { %p166_p3 = por %p165_p2, %p164_p1 }
  0x20   :  { %p167_p4 = pnand %p166_p3, %p160_p0 }
  0x22   :  { %170 = shalt.err (!%p167_p4)
}
  0x23   :  { %s171_s29 = scalar_lea.hbm %s407_s2, 4096 }
  0x24   :  { %p172_p5 = scmp.ne.s32.totalorder %s407_s2, %s171_s29  ;;  %p175_p6 = scmp.lt.u32.totalorder %s171_s29, %s407_s2 }
  0x26   :  { %p177_p7 = pnand %p175_p6, %p172_p5 }
  0x28   :  { %180 = shalt.err (!%p177_p7)
}
  0x29   :  { %s184_s5 = smov 256   ;;  %s185_s6 = smov 16  }
  0x2a   :  { %151 = dma.vmem_to_hbm [thread:$0]  %s146_s18, 4096, %s407_s2, [#allocation3], %s184_s5, %s184_s5, %s185_s6  }
  0x2b   :  { %181 = dma.done.wait [#allocation3], 4096  }
  0x2c   :  { %182 = vsyncadd [#allocation3], 4294963200 }
  0x2d   :  { %155 = vsyncpa [#allocation3], 1 }

</bundles_post_ra>
